<compile_context>
chip_gen: v5e
topology: v5e:2x2
jax: 0.10.0
libtpu: 0.0.40
codegen_flags: <defaults>
</compile_context>

<pallas_src>
import functools

import jax
import jax.numpy as jnp
from jax.experimental import pallas as pl
from jax.experimental.pallas import tpu as pltpu


def _adain_kernel(x_ref, w_ref, b_ref, o_ref, *, eps, inv_n):
    # x_ref: (TR, HW)   w_ref/b_ref: (TR, 1) f32   o_ref: (TR, HW)
    x = x_ref[...].astype(jnp.float32)

    # Shifted one-pass statistics: pivot on the first column of each row so the
    # sums accumulate (x - pivot), which is O(std)-sized even when |mean| >> std.
    pivot = x[:, :1]
    xs = x - pivot
    s1 = jnp.sum(xs, axis=-1, keepdims=True)
    s2 = jnp.sum(xs * xs, axis=-1, keepdims=True)
    mu_s = s1 * inv_n
    var = jnp.maximum(s2 * inv_n - mu_s * mu_s, 0.0)  # biased var, as batch_norm training=True
    inv_std = jax.lax.rsqrt(var + eps)                # EUP
    mean = mu_s + pivot

    # Fold normalization + affine into 2 per-element VALU ops.
    scale = w_ref[...] * inv_std       # per-row, f32
    shift = b_ref[...] - mean * scale  # per-row, f32
    o_ref[...] = (x * scale + shift).astype(o_ref.dtype)


def adaptive_instance_norm_2d(x, weight, bias, eps=1e-5, block_rows=None):
    """x: NCHW array. weight/bias: shape (B*C,) AdaIN affine params (kept f32)."""
    B, C, H, W = x.shape
    rows = B * C
    hw = H * W

    # Pure reshapes (no data movement), no padding, no post-slice.
    x2 = x.reshape(rows, hw)
    w2 = weight.reshape(rows, 1).astype(jnp.float32)
    b2 = bias.reshape(rows, 1).astype(jnp.float32)

    itemsize = jnp.dtype(x.dtype).itemsize
    sub = {4: 8, 2: 16, 1: 32}.get(itemsize, 8)  # sublane packing for x's dtype

    # Physical VMEM (per TensorCore); fall back to the smallest (v7x, 64 MiB).
    try:
        phys_vmem = int(pltpu.get_tpu_info().vmem_capacity_bytes)
    except Exception:  # pragma: no cover - conservative fallback
        phys_vmem = 64 << 20

    # Per-step VMEM estimate: in + out double-buffered in x.dtype, plus ~3
    # block-sized f32 temporaries (x upcast, shifted copy / x*x, output temp).
    def vmem_est(tr_):
        blk = tr_ * hw
        return 4 * blk * itemsize + 3 * blk * 4

    if block_rows is None:
        # ~2 MiB of *input* bytes per block (>= ~85% of HBM roofline in measured sweeps).
        target_in_bytes = 2 * 1024 * 1024
        tr = max(sub, (target_in_bytes // max(hw * itemsize, 1)) // sub * sub)
    else:
        tr = max(sub, (block_rows // sub) * sub)
    tr = max(1, min(tr, rows))  # tr == rows hits the "full array dim" exception if unaligned

    # Shrink the block until the working set leaves headroom under physical VMEM.
    vmem_budget = int(phys_vmem * 0.7)
    while tr > sub and vmem_est(tr) > vmem_budget:
        tr = max(sub, ((tr // 2) // sub) * sub)
    tr = max(1, min(tr, rows))

    grid = pl.cdiv(rows, tr)  # ragged trailing block is fine: rows are independent

    # Explicit scoped-VMEM limit: at least the estimate (+ slack), never below the
    # 32 MiB default class, never above what the chip physically has.
    vmem_limit = int(min(max(vmem_est(tr) + (4 << 20), 32 << 20), phys_vmem))

    out = pl.pallas_call(
        functools.partial(_adain_kernel, eps=float(eps), inv_n=1.0 / float(hw)),
        out_shape=jax.ShapeDtypeStruct((rows, hw), x.dtype),
        grid_spec=pltpu.PrefetchScalarGridSpec(
            num_scalar_prefetch=0,
            grid=(grid,),
            in_specs=[
                pl.BlockSpec((tr, hw), lambda i: (i, 0)),
                pl.BlockSpec((tr, 1), lambda i: (i, 0)),
                pl.BlockSpec((tr, 1), lambda i: (i, 0)),
            ],
            out_specs=pl.BlockSpec((tr, hw), lambda i: (i, 0)),
        ),
        compiler_params=pltpu.CompilerParams(
            # Row blocks are fully independent (no carried accumulator) ->
            # parallel lets Mosaic shard them across both TCs on v7x.
            dimension_semantics=("parallel",),
            vmem_limit_bytes=vmem_limit,
        ),
    )(x2, w2, b2)

    return out.reshape(B, C, H, W)


def _reference(x, weight, bias, eps=1e-5):
    B, C, H, W = x.shape
    xf = x.reshape(B * C, H * W).astype(jnp.float32)
    mean = xf.mean(axis=1, keepdims=True)
    var = ((xf - mean) ** 2).mean(axis=1, keepdims=True)
    out = (xf - mean) / jnp.sqrt(var + eps)
    out = out * weight[:, None].astype(jnp.float32) + bias[:, None].astype(jnp.float32)
    return out.reshape(B, C, H, W).astype(x.dtype)


if __name__ == "__main__":
    key = jax.random.PRNGKey(0)
    B, C, H, W = 2, 4, 16, 16  # num_features = C = 4

    kx, kw, kb = jax.random.split(key, 3)
    x = jax.random.normal(kx, (B, C, H, W), dtype=jnp.float32)
    # AdaIN weight/bias are assigned externally and have shape (B*C,)
    weight = jax.random.normal(kw, (B * C,), dtype=jnp.float32)
    bias = jax.random.normal(kb, (B * C,), dtype=jnp.float32)

    out = adaptive_instance_norm_2d(x, weight, bias, eps=1e-5)
    out = jax.block_until_ready(out)

    ref = _reference(x, weight, bias, eps=1e-5)
    assert out.shape == (B, C, H, W)
    assert jnp.allclose(out, ref, atol=1e-4, rtol=1e-4)

    print("KERNEL_OK")
</pallas_src>

<mosaic_0001>
module attributes {stable_mosaic.version = 11 : i64} {
  func.func @_adain_kernel(%arg0: i32, %arg1: memref<8x256xf32, #tpu.memory_space<vmem>>, %arg2: memref<8x1xf32, #tpu.memory_space<vmem>>, %arg3: memref<8x1xf32, #tpu.memory_space<vmem>>, %arg4: memref<8x256xf32, #tpu.memory_space<vmem>>) attributes {dimension_semantics = [#tpu.dimension_semantics<parallel>], iteration_bounds = array<i64: 1>, scalar_prefetch = 0 : i64, scratch_operands = 0 : i64, tpu.core_type = #tpu.core_type<tc>, window_params = [{transform_indices = @transform_0, window_bounds = array<i64: 8, 256>}, {transform_indices = @transform_1, window_bounds = array<i64: 8, 1>}, {transform_indices = @transform_2, window_bounds = array<i64: 8, 1>}, {transform_indices = @transform_3, window_bounds = array<i64: 8, 256>}]} {
    %c0 = arith.constant 0 : index
    %c0_0 = arith.constant 0 : index
    %0 = vector.load %arg1[%c0, %c0_0] : memref<8x256xf32, #tpu.memory_space<vmem>>, vector<8x256xf32>
    %1 = vector.extract_strided_slice %0 {offsets = [0, 0], sizes = [8, 1], strides = [1, 1]} : vector<8x256xf32> to vector<8x1xf32>
    %2 = vector.broadcast %1 : vector<8x1xf32> to vector<8x256xf32>
    %3 = arith.subf %0, %2 : vector<8x256xf32>
    %cst = arith.constant dense<0.000000e+00> : vector<8xf32>
    %4 = vector.multi_reduction <add>, %3, %cst [1] : vector<8x256xf32> to vector<8xf32>
    %5 = vector.shape_cast %4 : vector<8xf32> to vector<8x1xf32>
    %6 = arith.mulf %3, %3 : vector<8x256xf32>
    %cst_1 = arith.constant dense<0.000000e+00> : vector<8xf32>
    %7 = vector.multi_reduction <add>, %6, %cst_1 [1] : vector<8x256xf32> to vector<8xf32>
    %8 = vector.shape_cast %7 : vector<8xf32> to vector<8x1xf32>
    %cst_2 = arith.constant 3.906250e-03 : f32
    %9 = vector.broadcast %cst_2 : f32 to vector<8x1xf32>
    %10 = arith.mulf %5, %9 : vector<8x1xf32>
    %cst_3 = arith.constant 3.906250e-03 : f32
    %11 = vector.broadcast %cst_3 : f32 to vector<8x1xf32>
    %12 = arith.mulf %8, %11 : vector<8x1xf32>
    %13 = arith.mulf %10, %10 : vector<8x1xf32>
    %14 = arith.subf %12, %13 : vector<8x1xf32>
    %cst_4 = arith.constant 0.000000e+00 : f32
    %15 = vector.broadcast %cst_4 : f32 to vector<8x1xf32>
    %16 = arith.maximumf %14, %15 : vector<8x1xf32>
    %cst_5 = arith.constant 9.99999974E-6 : f32
    %17 = vector.broadcast %cst_5 : f32 to vector<8x1xf32>
    %18 = arith.addf %16, %17 : vector<8x1xf32>
    %19 = math.rsqrt %18 : vector<8x1xf32>
    %20 = arith.addf %10, %1 : vector<8x1xf32>
    %c0_6 = arith.constant 0 : index
    %c0_7 = arith.constant 0 : index
    %21 = vector.load %arg2[%c0_6, %c0_7] : memref<8x1xf32, #tpu.memory_space<vmem>>, vector<8x1xf32>
    %22 = arith.mulf %21, %19 : vector<8x1xf32>
    %c0_8 = arith.constant 0 : index
    %c0_9 = arith.constant 0 : index
    %23 = vector.load %arg3[%c0_8, %c0_9] : memref<8x1xf32, #tpu.memory_space<vmem>>, vector<8x1xf32>
    %24 = arith.mulf %20, %22 : vector<8x1xf32>
    %25 = arith.subf %23, %24 : vector<8x1xf32>
    %26 = vector.broadcast %22 : vector<8x1xf32> to vector<8x256xf32>
    %27 = arith.mulf %0, %26 : vector<8x256xf32>
    %28 = vector.broadcast %25 : vector<8x1xf32> to vector<8x256xf32>
    %29 = arith.addf %27, %28 : vector<8x256xf32>
    %c0_10 = arith.constant 0 : index
    %c0_11 = arith.constant 0 : index
    %30 = vector.load %arg4[%c0_10, %c0_11] : memref<8x256xf32, #tpu.memory_space<vmem>>, vector<8x256xf32>
    tpu.vector_store %arg4[%c0_10, %c0_11], %29 {strides = array<i32>} : memref<8x256xf32, #tpu.memory_space<vmem>>, vector<8x256xf32>,
    return
  }
  func.func @transform_0(%arg0: i32) -> (i32, i32) {
    %c0_i32 = arith.constant 0 : i32
    %c0_i32_0 = arith.constant 0 : i32
    return %arg0, %c0_i32 : i32, i32
  }
  func.func @transform_1(%arg0: i32) -> (i32, i32) {
    %c0_i32 = arith.constant 0 : i32
    %c0_i32_0 = arith.constant 0 : i32
    return %arg0, %c0_i32 : i32, i32
  }
  func.func @transform_2(%arg0: i32) -> (i32, i32) {
    %c0_i32 = arith.constant 0 : i32
    %c0_i32_0 = arith.constant 0 : i32
    return %arg0, %c0_i32 : i32, i32
  }
  func.func @transform_3(%arg0: i32) -> (i32, i32) {
    %c0_i32 = arith.constant 0 : i32
    %c0_i32_0 = arith.constant 0 : i32
    return %arg0, %c0_i32 : i32, i32
  }
}

</mosaic_0001>

<bundles_post_ra>
// kernel: tpu_custom_call.1
= control target key start
LH: loop header
LB: loop body
LE: loop exit
PB: predicated region body
PF: predicated region fallthrough
CT: control target
= control target key end

     0   :  { %s156_s0 = inlined_call_operand.vmem [shape: f32[8,256], index: 0, kind: input, shape index: {}]   ;;  %s157_s1 = inlined_call_operand.vmem [shape: f32[8,1], index: 1, kind: input, shape index: {}]   ;;  %s158_s2 = inlined_call_operand.vmem [shape: f32[8,1], index: 2, kind: input, shape index: {}]   ;;  %s159_s3 = inlined_call_operand.hbm [shape: f32[8,256], index: 3, kind: output, shape index: {}]  }
   0x1   :  { %v15_v0 = vld [vmem:[%s156_s0] sm:$0xff] }
   0x2   :  { %8 = vsyncpa [#allocation3], 0  ;;  %v119_v1 = vmov 0   ;;  %v16_v2 = vld [vmem:[%s156_s0 + $0x8] sm:$0xff]  ;;  %v49_v24 = vld [vmem:[%s157_s1] sm:$0xff]  ;;  %s120_s19 = smov [#allocation2]  }
   0x3   :  { %88 = vset.pattern.permute.xlu0 %v119_v1  ;;  %89 = vset.pattern.permute.xlu1 %v119_v1  ;;  %v51_v28 = vld [vmem:[%s158_s2] sm:$0xff]  ;;  %s75_s20 = sshll.u32 %s120_s19, 4  ;;  %s77_s1 = sshll.u32 %s159_s3, 4  ;;  %s76_s20 = int_to_ptr.vmem [resolvable:$true] %s75_s20  ;;  %s78_s1 = int_to_ptr.hbm [resolvable:$true] %s77_s1 }
   0x4   :  { %19 = vperm.xlu0 %88, %v15_v0   ;;  %90 = vset.pattern.permute.xlu2 %v119_v1 }
  0x76   :  { %v20_v3 = vpop.permute.xlu0 %19 }
  0x77   :  { %v22_v4 = vsub.f32 %v15_v0, %v20_v3  ;;  %v23_v5 = vsub.f32 %v16_v2, %v20_v3 }
  0x79   :  { %v24_v6 = vadd.f32 %v23_v5, %v22_v4  ;;  %v27_v7 = vmul.f32 %v22_v4, %v22_v4  ;;  %v28_v8 = vmul.f32 %v23_v5, %v23_v5 }
  0x7b   :  { %25 = vadd.xlane.f32.xlu0 %v24_v6  ;;  %v29_v9 = vadd.f32 %v28_v8, %v27_v7 }
  0x7d   :  { %30 = vadd.xlane.f32.xlu1 %v29_v9 }
  0xee   :  { %v26_v10 = vpop.xlane.xlu0 %25 }
  0xef   :  { %v32_v11 = vmul.f32 0.00390625, %v26_v10 }
  0xf0   :  { %v31_v12 = vpop.xlane.xlu1 %30 }
  0xf1   :  { %v34_v13 = vmul.f32 %v32_v11, %v32_v11  ;;  %v33_v14 = vmul.f32 0.00390625, %v31_v12  ;;  %v48_v26 = vadd.f32 %v32_v11, %v15_v0 }
  0xf3   :  { %v35_v15 = vsub.f32 %v33_v14, %v34_v13 }
  0xf5   :  { %v36_v16 = vmax.f32 %v35_v15, 0.0 }
  0xf7   :  { %v37_v17 = vadd.f32 1e-05, %v36_v16 }
  0xf9   :  { %91 = vrsqrt.f32 %v37_v17  ;;  %vm44_vm1 = vweird.f32 %v37_v17 }
  0xff   :  { %v92_v18 = vpop.eup %91 }
 0x100   :  { %v39_v19 = vmul.f32 %v92_v18, %v37_v17  ;;  %vm45_vm0 = vweird.f32 %v92_v18 }
 0x101   :  { %vm46_vm2 = vmor %vm44_vm1, %vm45_vm0 }
 0x102   :  { %v40_v20 = vmul.f32 %v92_v18, %v39_v19 }
 0x104   :  { %v41_v21 = vmul.f32 0.5, %v40_v20 }
 0x106   :  { %v42_v22 = vsub.f32 1.5, %v41_v21 }
 0x108   :  { %v43_v23 = vmul.f32 %v92_v18, %v42_v22 }
 0x10a   :  { %v47_v25 = vsel %vm46_vm2, %v92_v18, %v43_v23 }
 0x10b   :  { %v50_v27 = vmul.f32 %v49_v24, %v47_v25 }
 0x10d   :  { %56 = vperm.xlu1 %89, %v50_v27   ;;  %v52_v29 = vmul.f32 %v50_v27, %v48_v26 }
 0x10f   :  { %v53_v30 = vsub.f32 %v51_v28, %v52_v29 }
 0x111   :  { %63 = vperm.xlu2 %90, %v53_v30  }
 0x16b   :  { %v64_v34 = vpop.permute.xlu2 %63 }
 0x17f   :  { %v57_v31 = vpop.permute.xlu1 %56 }
 0x180   :  { %v59_v32 = vmul.f32 %v57_v31, %v15_v0  ;;  %v60_v33 = vmul.f32 %v57_v31, %v16_v2 }
 0x182   :  { %v66_v35 = vadd.f32 %v64_v34, %v59_v32  ;;  %v67_v36 = vadd.f32 %v64_v34, %v60_v33 }
 0x184   :  { %68 = vst [vmem:[#allocation2] sm:$0xff] %v66_v35 }
 0x185   :  { %69 = vst [vmem:[#allocation2 + $0x8] sm:$0xff] %v67_v36 }
 0x186   :  { %80 = dma.vmem_to_hbm [thread:$0]  %s76_s20, 256, %s78_s1, [#allocation3]  }
 0x187   :  { %117 = dma.done.wait [#allocation3], 256  }
 0x188   :  { %118 = vsyncadd [#allocation3], 4294967040 }
 0x189   :  { %85 = vsyncpa [#allocation3], 1 }

</bundles_post_ra>
